<compile_context>
chip_gen: v7x
topology: tpu7x:2x2x1
jax: 0.10.0
libtpu: 0.0.40
codegen_flags: <defaults>
</compile_context>

<pallas_src>
import math

import jax
import jax.numpy as jnp
from jax import lax
from jax.experimental import pallas as pl
from jax.experimental.pallas import tpu as pltpu


# ----------------------------- Pallas kernels ------------------------------

def _mm_kernel(a_ref, b_ref, o_ref, acc_ref):
    """Tiled matmul with f32 accumulator; reduction axis = grid dim 2."""
    @pl.when(pl.program_id(2) == 0)
    def _init():
        acc_ref[...] = jnp.zeros_like(acc_ref)

    acc_ref[...] += jnp.dot(a_ref[...], b_ref[...],
                            preferred_element_type=jnp.float32)

    @pl.when(pl.program_id(2) == pl.num_programs(2) - 1)
    def _done():
        o_ref[...] = acc_ref[...].astype(o_ref.dtype)


def _mm_l2norm_kernel(a_ref, b_ref, o_ref, acc_ref):
    """Tiled matmul + fused row-L2 normalization on the finalize step.

    Requires the full (padded) feature dimension in a single output tile so
    the row norm is complete.  Uses rsqrt on the squared norm (EUP slot),
    guarded with `where(sq > 0, ...)` to preserve the inf -> 0 semantics of
    normalize_l2 for all-zero rows.
    """
    @pl.when(pl.program_id(2) == 0)
    def _init():
        acc_ref[...] = jnp.zeros_like(acc_ref)

    acc_ref[...] += jnp.dot(a_ref[...], b_ref[...],
                            preferred_element_type=jnp.float32)

    @pl.when(pl.program_id(2) == pl.num_programs(2) - 1)
    def _done():
        xv = acc_ref[...]
        sq = jnp.sum(xv * xv, axis=1, keepdims=True)
        scale = jnp.where(sq > 0.0, lax.rsqrt(sq), 0.0)
        o_ref[...] = (xv * scale).astype(o_ref.dtype)


def _tiled_matmul(a, b, out_dtype, *, tm, tk, tn, l2norm=False):
    """a:[M,K] @ b:[K,N] with (tm,tk,tn) tiles; optional fused row-L2 norm."""
    M, K = a.shape
    K2, N = b.shape
    assert K == K2
    assert M % tm == 0 and K % tk == 0 and N % tn == 0
    if l2norm:
        assert tn == N, "fused row-L2 norm needs the full feature dim per tile"

    kernel = _mm_l2norm_kernel if l2norm else _mm_kernel
    return pl.pallas_call(
        kernel,
        out_shape=jax.ShapeDtypeStruct((M, N), out_dtype),
        grid_spec=pltpu.PrefetchScalarGridSpec(
            num_scalar_prefetch=0,
            grid=(M // tm, N // tn, K // tk),
            in_specs=[
                pl.BlockSpec((tm, tk), lambda i, j, k: (i, k)),
                pl.BlockSpec((tk, tn), lambda i, j, k: (k, j)),
            ],
            out_specs=pl.BlockSpec((tm, tn), lambda i, j, k: (i, j)),
            scratch_shapes=[pltpu.VMEM((tm, tn), jnp.float32)],
        ),
        compiler_params=pltpu.CompilerParams(
            dimension_semantics=("parallel", "parallel", "arbitrary"),
            vmem_limit_bytes=48 * 1024 * 1024,   # explicit, with v7x headroom
        ),
    )(a, b)


# ------------------------------ Python wrapper ------------------------------

def _round_up(x, m):
    return -(-x // m) * m


def _tile(dim, pref):
    """Largest multiple of 128 that is <= pref and divides dim (dim % 128 == 0)."""
    t = pref
    while dim % t:
        t -= 128
    return t


def unigcn_conv(X, W, vertex, edges, dege, degv, *,
                first_aggregate="mean", use_norm=True,
                row_tile=256):
    """UniGCNConv forward.  X:[N,C_in], W:[D,C_in] (nn.Linear weight layout),
    vertex/edges: incidence index lists, dege:[E(,1)], degv:[N(,1)]."""
    N, C_in = X.shape
    D = W.shape[0]                       # heads * out_channels
    dege = jnp.reshape(dege, (-1, 1)).astype(jnp.float32)
    degv = jnp.reshape(degv, (-1, 1)).astype(jnp.float32)
    E = dege.shape[0]

    # ---- glue (plain JAX): dense incidence with degree scalings folded in ----
    H = jnp.zeros((E, N), jnp.float32).at[edges, vertex].add(1.0)
    if first_aggregate == "mean":
        counts = jnp.sum(H, axis=1, keepdims=True)
        Hm = H / jnp.where(counts > 0, counts, 1.0)   # scatter-mean == row-mean of H
    else:  # 'sum'
        Hm = H
    Hm_s = dege * Hm          # fold `Xe * dege` into the first aggregation
    Ht_s = degv * H.T         # fold `Xv * degv` into the second aggregation

    # ---- pad to lane/tile-aligned shapes; bf16 MXU operands, f32 accumulate ----
    C_pad = _round_up(C_in, 128)
    D_pad = _round_up(D, 128)
    N_pad = _round_up(N, row_tile)
    E_pad = _round_up(E, row_tile)

    bf16 = jnp.bfloat16
    Xp = jnp.zeros((N_pad, C_pad), bf16).at[:N, :C_in].set(X.astype(bf16))
    Wtp = jnp.zeros((C_pad, D_pad), bf16).at[:C_in, :D].set(W.T.astype(bf16))
    Hmp = jnp.zeros((E_pad, N_pad), bf16).at[:E, :N].set(Hm_s.astype(bf16))
    Htp = jnp.zeros((N_pad, E_pad), bf16).at[:N, :E].set(Ht_s.astype(bf16))

    tk_c = _tile(C_pad, 512)
    tn_d = _tile(D_pad, 512)

    # 1) linear:            XW = X @ W.T            [N_pad, D_pad]
    XW = _tiled_matmul(Xp, Wtp, bf16, tm=row_tile, tk=tk_c, tn=tn_d)
    # 2) scatter-mean+dege: Xe = Hm_s @ XW          [E_pad, D_pad]
    Xe = _tiled_matmul(Hmp, XW, bf16, tm=row_tile, tk=row_tile, tn=tn_d)
    # 3) scatter-sum+degv (+ fused row-L2 norm):    [N_pad, D_pad]
    Xv = _tiled_matmul(Htp, Xe, jnp.float32, tm=row_tile, tk=row_tile,
                       tn=D_pad, l2norm=use_norm)

    return Xv[:N, :D]


# ------------------------------ JAX reference -------------------------------

def ref_forward(X, W, vertex, edges, dege, degv, E,
                first_aggregate="mean", use_norm=True):
    """Pure-JAX reference mirroring the PyTorch forward (true scatter ops)."""
    N = X.shape[0]
    XW = X @ W.T
    D = XW.shape[1]
    Xve = XW[vertex]
    sums = jnp.zeros((E, D), jnp.float32).at[edges].add(Xve)
    if first_aggregate == "mean":
        counts = jnp.zeros((E,), jnp.float32).at[edges].add(1.0)
        Xe = sums / jnp.where(counts > 0, counts, 1.0)[:, None]
    else:
        Xe = sums
    Xe = Xe * jnp.reshape(dege, (-1, 1))
    Xev = Xe[edges]
    Xv = jnp.zeros((N, D), jnp.float32).at[vertex].add(Xev)
    Xv = Xv * jnp.reshape(degv, (-1, 1))
    if use_norm:
        rn = jnp.linalg.norm(Xv, axis=1, keepdims=True)
        sc = jnp.where(rn > 0, 1.0 / rn, 0.0)
        Xv = Xv * sc
    return Xv


# ---------------------------------- main ------------------------------------

if __name__ == "__main__":
    key = jax.random.PRNGKey(0)
    N, E, C_in = 16, 8, 32
    heads, out_channels = 8, 16            # D = heads * out_channels = 128
    D = heads * out_channels
    k_per_edge = 4
    nnz = E * k_per_edge

    k_v, k_x, k_w = jax.random.split(key, 3)
    vertex = jax.random.randint(k_v, (nnz,), 0, N)
    edges = jnp.repeat(jnp.arange(E), k_per_edge)

    X = jax.random.normal(k_x, (N, C_in), jnp.float32)

    # nn.Linear(C_in, heads*out_channels, bias=False) weight layout [out, in]
    bound = 1.0 / math.sqrt(C_in)
    W = jax.random.uniform(k_w, (D, C_in), jnp.float32, -bound, bound)

    # Deterministic UniGCN-style degree scalings (stand-ins for args.dege/degv)
    H = jnp.zeros((E, N), jnp.float32).at[edges, vertex].add(1.0)
    counts = jnp.sum(H, axis=1, keepdims=True)
    dv = jnp.sum(H, axis=0)                                   # vertex degree
    degv = jnp.where(dv > 0, dv ** -0.5, 0.0)[:, None]        # [N, 1]
    de = (H @ degv) / jnp.where(counts > 0, counts, 1.0)      # mean over members
    dege = jnp.where(de > 0, de ** -0.5, 0.0)                 # [E, 1]

    out = unigcn_conv(X, W, vertex, edges, dege, degv,
                      first_aggregate="mean", use_norm=True)
    out = jax.block_until_ready(out)

    ref = ref_forward(X, W, vertex, edges, dege, degv, E,
                      first_aggregate="mean", use_norm=True)

    assert out.shape == (N, D)
    max_err = float(jnp.max(jnp.abs(out - ref)))
    # bf16 MXU operands (f32 accumulation) -> loosened tolerance vs f32 reference
    assert jnp.allclose(out, ref, atol=3e-2, rtol=3e-2), (
        f"mismatch vs reference, max abs err {max_err}")

    print("KERNEL_OK")
</pallas_src>

<mosaic_0001>
module attributes {stable_mosaic.version = 11 : i64} {
  func.func @_mm_kernel(%arg0: i32, %arg1: i32, %arg2: i32, %arg3: memref<256x128xbf16, #tpu.memory_space<vmem>>, %arg4: memref<128x128xbf16, #tpu.memory_space<vmem>>, %arg5: memref<256x128xbf16, #tpu.memory_space<vmem>>, %arg6: memref<256x128xf32, #tpu.memory_space<vmem>>) attributes {dimension_semantics = [#tpu.dimension_semantics<parallel>, #tpu.dimension_semantics<parallel>, #tpu.dimension_semantics<arbitrary>], iteration_bounds = array<i64: 1, 1, 1>, scalar_prefetch = 0 : i64, scratch_operands = 1 : i64, tpu.core_type = #tpu.core_type<tc>, window_params = [{transform_indices = @transform_0, window_bounds = array<i64: 256, 128>}, {transform_indices = @transform_1, window_bounds = array<i64: 128, 128>}, {transform_indices = @transform_2, window_bounds = array<i64: 256, 128>}]} {
    %c0_i32 = arith.constant 0 : i32
    %0 = arith.cmpi eq, %arg2, %c0_i32 : i32
    %1 = arith.extui %0 : i1 to i32
    %c0_i32_0 = arith.constant 0 : i32
    %2 = arith.cmpi ne, %1, %c0_i32_0 : i32
    scf.if %2 {
      %cst_10 = arith.constant 0.000000e+00 : f32
      %12 = vector.broadcast %cst_10 : f32 to vector<256x128xf32>
      %c0_11 = arith.constant 0 : index
      %c0_12 = arith.constant 0 : index
      %13 = vector.load %arg6[%c0_11, %c0_12] : memref<256x128xf32, #tpu.memory_space<vmem>>, vector<256x128xf32>
      tpu.vector_store %arg6[%c0_11, %c0_12], %12 {strides = array<i32>} : memref<256x128xf32, #tpu.memory_space<vmem>>, vector<256x128xf32>,
    } else {
    }
    %c0 = arith.constant 0 : index
    %c0_1 = arith.constant 0 : index
    %3 = vector.load %arg6[%c0, %c0_1] : memref<256x128xf32, #tpu.memory_space<vmem>>, vector<256x128xf32>
    %c0_2 = arith.constant 0 : index
    %c0_3 = arith.constant 0 : index
    %4 = vector.load %arg3[%c0_2, %c0_3] : memref<256x128xbf16, #tpu.memory_space<vmem>>, vector<256x128xbf16>
    %c0_4 = arith.constant 0 : index
    %c0_5 = arith.constant 0 : index
    %5 = vector.load %arg4[%c0_4, %c0_5] : memref<128x128xbf16, #tpu.memory_space<vmem>>, vector<128x128xbf16>
    %cst = arith.constant dense<0.000000e+00> : vector<256x128xf32>
    %6 = tpu.matmul %4, %5, %cst {dimension_numbers = #tpu.dot_dimension_numbers<[1], [0], [0], [1], [0, 0, 1, 1], [], []>} : vector<256x128xbf16>, vector<128x128xbf16>, vector<256x128xf32> -> vector<256x128xf32>
    %7 = arith.addf %3, %6 : vector<256x128xf32>
    %c0_6 = arith.constant 0 : index
    %c0_7 = arith.constant 0 : index
    %8 = vector.load %arg6[%c0_6, %c0_7] : memref<256x128xf32, #tpu.memory_space<vmem>>, vector<256x128xf32>
    tpu.vector_store %arg6[%c0_6, %c0_7], %7 {strides = array<i32>} : memref<256x128xf32, #tpu.memory_space<vmem>>, vector<256x128xf32>,
    %c0_i32_8 = arith.constant 0 : i32
    %9 = arith.cmpi eq, %arg2, %c0_i32_8 : i32
    %10 = arith.extui %9 : i1 to i32
    %c0_i32_9 = arith.constant 0 : i32
    %11 = arith.cmpi ne, %10, %c0_i32_9 : i32
    scf.if %11 {
      %c0_10 = arith.constant 0 : index
      %c0_11 = arith.constant 0 : index
      %12 = vector.load %arg6[%c0_10, %c0_11] : memref<256x128xf32, #tpu.memory_space<vmem>>, vector<256x128xf32>
      %13 = arith.truncf %12 : vector<256x128xf32> to vector<256x128xbf16>
      %c0_12 = arith.constant 0 : index
      %c0_13 = arith.constant 0 : index
      %14 = vector.load %arg5[%c0_12, %c0_13] : memref<256x128xbf16, #tpu.memory_space<vmem>>, vector<256x128xbf16>
      tpu.vector_store %arg5[%c0_12, %c0_13], %13 {strides = array<i32>} : memref<256x128xbf16, #tpu.memory_space<vmem>>, vector<256x128xbf16>,
    } else {
    }
    return
  }
  func.func @transform_0(%arg0: i32, %arg1: i32, %arg2: i32) -> (i32, i32) {
    %c0_i32 = arith.constant 0 : i32
    return %arg0, %arg2 : i32, i32
  }
  func.func @transform_1(%arg0: i32, %arg1: i32, %arg2: i32) -> (i32, i32) {
    %c0_i32 = arith.constant 0 : i32
    return %arg2, %arg1 : i32, i32
  }
  func.func @transform_2(%arg0: i32, %arg1: i32, %arg2: i32) -> (i32, i32) {
    %c0_i32 = arith.constant 0 : i32
    return %arg0, %arg1 : i32, i32
  }
}

</mosaic_0001>

<bundles_post_ra>
// kernel: tpu_custom_call.1
= control target key start
LH: loop header
LB: loop body
LE: loop exit
PB: predicated region body
PF: predicated region fallthrough
CT: control target
= control target key end

     0   :  { %7 = vsyncpa [#allocation4], 0  ;;  %s1176_s0 = inlined_call_operand.hbm [shape: bf16[256,128], index: 0, kind: input, shape index: {}]   ;;  %s1177_s1 = inlined_call_operand.hbm [shape: bf16[128,128], index: 1, kind: input, shape index: {}]   ;;  %s1178_s2 = inlined_call_operand.hbm [shape: bf16[256,128], index: 2, kind: output, shape index: {}]  }
   0x1   :  { %8 = vsyncpa [#allocation7], 0 }
   0x2   :  { %9 = vsyncpa [#allocation5], 0  ;;  %s1111_s9 = smov [#allocation3]   ;;  %s1039_s13 = scalar_lea.hbm %s1176_s0, 2048 }
   0x3   :  { %s15_s10 = sshll.u32 %s1111_s9, 4  ;;  %p1040_p0 = scmp.ne.s32.totalorder %s1176_s0, %s1039_s13  ;;  %s16_s10 = int_to_ptr.vmem [resolvable:$true] %s15_s10 }
   0x4   :  { %p1043_p1 = scmp.lt.u32.totalorder %s1039_s13, %s1176_s0 }
   0x6   :  { %p1045_p2 = pnand %p1043_p1, %p1040_p0 }
   0x8   :  { %1048 = shalt.err (!%p1045_p2)
}
   0x9   :  { %s1049_s18 = scalar_lea.vmem %s16_s10, 2048  ;;  %p1054_p4 = scmp.lt.s32.totalorder %s16_s10, %s16_s10 }
   0xa   :  { %p1050_p3 = scmp.ne.s32.totalorder %s16_s10, %s1049_s18  ;;  %p1055_p5 = scmp.lt.s32.totalorder %s1049_s18, %s1049_s18 }
   0xc   :  { %p1056_p6 = por %p1055_p5, %p1054_p4 }
   0xe   :  { %p1057_p7 = pnand %p1056_p6, %p1050_p3 }
  0x10   :  { %1060 = shalt.err (!%p1057_p7)
}
  0x11   :  { %s1112_s19 = smov 64   ;;  %s1113_s20 = smov 4  }
  0x12   :  { %21 = dma.hbm_to_vmem [thread:$0]  %s1176_s0, 2048, %s16_s10, [#allocation4], %s1112_s19, %s1112_s19, %s1113_s20  }
  0x13   :  { %s1114_s23 = smov [#allocation6]   ;;  %s1061_s27 = scalar_lea.hbm %s1177_s1, 1024 }
  0x14   :  { %s27_s24 = sshll.u32 %s1114_s23, 4  ;;  %p1062_p8 = scmp.ne.s32.totalorder %s1177_s1, %s1061_s27  ;;  %s28_s24 = int_to_ptr.vmem [resolvable:$true] %s27_s24 }
  0x15   :  { %p1065_p9 = scmp.lt.u32.totalorder %s1061_s27, %s1177_s1 }
  0x17   :  { %p1067_p10 = pnand %p1065_p9, %p1062_p8 }
  0x19   :  { %1070 = shalt.err (!%p1067_p10)
}
  0x1a   :  { %s1071_s4 = scalar_lea.vmem %s28_s24, 1024  ;;  %p1076_p12 = scmp.lt.s32.totalorder %s28_s24, %s28_s24 }
  0x1b   :  { %p1072_p11 = scmp.ne.s32.totalorder %s28_s24, %s1071_s4  ;;  %p1077_p13 = scmp.lt.s32.totalorder %s1071_s4, %s1071_s4 }
  0x1d   :  { %p1078_p0 = por %p1077_p13, %p1076_p12 }
  0x1f   :  { %p1079_p1 = pnand %p1078_p0, %p1072_p11 }
  0x21   :  { %1082 = shalt.err (!%p1079_p1)
}
  0x22   :  { %33 = dma.hbm_to_vmem [thread:$0]  %s1177_s1, 1024, %s28_s24, [#allocation7], %s1112_s19, %s1112_s19, %s1113_s20  }
  0x23   :  { %1105 = dma.done.wait [#allocation4], 2048  }
  0x24   :  { %1106 = vsyncadd [#allocation4], 4294965248 }
  0x25   :  { %1107 = dma.done.wait [#allocation7], 1024  }
  0x26   :  { %1108 = vsyncadd [#allocation7], 4294966272  ;;  %v1015_v0 = vld [vmem:[#allocation6] sm:$0xff]   ;;  %v1016_v1 = vld [vmem:[#allocation6 + $0x8] sm:$0xff]   ;;  %s1115_s1 = smov [#allocation8]  }
  0x27   :  { %946 = vmatprep.subr.bf16.mxu0 %v1015_v0  ;;  %994 = vmatprep.subr.bf16.mxu1 %v1015_v0  ;;  %v1017_v2 = vld [vmem:[#allocation6 + $0x10] sm:$0xff]   ;;  %v1018_v3 = vld [vmem:[#allocation6 + $0x18] sm:$0xff]   ;;  %v1023_v4 = vld [vmem:[#allocation3] sm:$0xff]   ;;  %s726_s6 = sshll.u32 %s1115_s1, 4  ;;  %s727_s6 = int_to_ptr.vmem [resolvable:$true] %s726_s6 }
  0x28   :  { %947 = vmatpush3.bf16.msra.mxu0 %v1015_v0  ;;  %1002 = vmatpush3.bf16.msra.mxu1 %v1015_v0  ;;  %v1024_v5 = vld [vmem:[#allocation3 + $0x40] sm:$0xff]   ;;  %v1020_v7 = vld [vmem:[#allocation6 + $0x28] sm:$0xff]   ;;  %v1021_v8 = vld [vmem:[#allocation6 + $0x30] sm:$0xff]   ;;  %s1083_s7 = scalar_lea.vmem %s727_s6, 2048  ;;  %p1088_p3 = scmp.lt.s32.totalorder %s727_s6, %s727_s6 }
  0x29   :  { %948 = vmatprep.subr.bf16.mxu0 %v1016_v1  ;;  %995 = vmatprep.subr.bf16.mxu1 %v1016_v1  ;;  %v1019_v6 = vld [vmem:[#allocation6 + $0x20] sm:$0xff]   ;;  %v1022_v9 = vld [vmem:[#allocation6 + $0x38] sm:$0xff]   ;;  %v1025_v10 = vld [vmem:[#allocation3 + $0x8] sm:$0xff]   ;;  %p1084_p2 = scmp.ne.s32.totalorder %s727_s6, %s1083_s7  ;;  %p1089_p4 = scmp.lt.s32.totalorder %s1083_s7, %s1083_s7 }
  0x2a   :  { %962 = vmatprep.mubr.bf16.mxu0 %v1023_v4  ;;  %978 = vmatprep.mubr.bf16.mxu1 %v1024_v5  ;;  %v1026_v11 = vld [vmem:[#allocation3 + $0x48] sm:$0xff]   ;;  %v1027_v12 = vld [vmem:[#allocation3 + $0x10] sm:$0xff]   ;;  %v1029_v14 = vld [vmem:[#allocation3 + $0x18] sm:$0xff]  }
  0x2b   :  { %v1028_v13 = vld [vmem:[#allocation3 + $0x50] sm:$0xff]   ;;  %v1030_v15 = vld [vmem:[#allocation3 + $0x58] sm:$0xff]   ;;  %v1031_v16 = vld [vmem:[#allocation3 + $0x20] sm:$0xff]   ;;  %p1090_p5 = por %p1089_p4, %p1088_p3 }
  0x2c   :  { %949 = vmatpush3.bf16.msra.mxu0 %v1016_v1  ;;  %1003 = vmatpush3.bf16.msra.mxu1 %v1016_v1  ;;  %v1032_v17 = vld [vmem:[#allocation3 + $0x60] sm:$0xff]   ;;  %v1033_v18 = vld [vmem:[#allocation3 + $0x28] sm:$0xff]   ;;  %v1035_v20 = vld [vmem:[#allocation3 + $0x30] sm:$0xff]  }
  0x2d   :  { %950 = vmatprep.subr.bf16.mxu0 %v1017_v2  ;;  %996 = vmatprep.subr.bf16.mxu1 %v1017_v2  ;;  %v1034_v19 = vld [vmem:[#allocation3 + $0x68] sm:$0xff]   ;;  %v1036_v21 = vld [vmem:[#allocation3 + $0x70] sm:$0xff]   ;;  %v1037_v22 = vld [vmem:[#allocation3 + $0x38] sm:$0xff]   ;;  %p1091_p6 = pnand %p1090_p5, %p1084_p2 }
  0x2e   :  { %v1038_v23 = vld [vmem:[#allocation3 + $0x78] sm:$0xff]  }
  0x30   :  { %951 = vmatpush3.bf16.msra.mxu0 %v1017_v2  ;;  %1004 = vmatpush3.bf16.msra.mxu1 %v1017_v2 }
  0x31   :  { %952 = vmatprep.subr.bf16.mxu0 %v1018_v3  ;;  %997 = vmatprep.subr.bf16.mxu1 %v1018_v3 }
  0x34   :  { %953 = vmatpush3.bf16.msra.mxu0 %v1018_v3  ;;  %1005 = vmatpush3.bf16.msra.mxu1 %v1018_v3 }
  0x35   :  { %954 = vmatprep.subr.bf16.mxu0 %v1019_v6  ;;  %998 = vmatprep.subr.bf16.mxu1 %v1019_v6 }
  0x38   :  { %955 = vmatpush3.bf16.msra.mxu0 %v1019_v6  ;;  %1006 = vmatpush3.bf16.msra.mxu1 %v1019_v6 }
  0x39   :  { %956 = vmatprep.subr.bf16.mxu0 %v1020_v7  ;;  %999 = vmatprep.subr.bf16.mxu1 %v1020_v7 }
  0x3c   :  { %957 = vmatpush3.bf16.msra.mxu0 %v1020_v7  ;;  %1007 = vmatpush3.bf16.msra.mxu1 %v1020_v7 }
  0x3d   :  { %958 = vmatprep.subr.bf16.mxu0 %v1021_v8  ;;  %1000 = vmatprep.subr.bf16.mxu1 %v1021_v8 }
  0x40   :  { %959 = vmatpush3.bf16.msra.mxu0 %v1021_v8  ;;  %1008 = vmatpush3.bf16.msra.mxu1 %v1021_v8 }
  0x41   :  { %960 = vmatprep.subr.bf16.mxu0 %v1022_v9  ;;  %1001 = vmatprep.subr.bf16.mxu1 %v1022_v9 }
  0x44   :  { %961 = vmatpush3.bf16.msra.mxu0 %v1022_v9  ;;  %1009 = vmatpush3.bf16.msra.mxu1 %v1022_v9 }
  0x47   :  { %963 = vmatmul.mubr.bf16.vlgmr.msra.gmra.mrb[0].mxu0 %v1025_v10  ;;  %979 = vmatmul.mubr.bf16.vlgmr.msra.gmra.mrb[0].mxu1 %v1026_v11 }
  0x48   :  { %966 = vmatprep.mubr.bf16.mxu0 %v1027_v12  ;;  %982 = vmatprep.mubr.bf16.mxu1 %v1028_v13 }
  0x4f   :  { %967 = vmatmul.mubr.bf16.gmra.mrb[4].mxu0 %v1029_v14  ;;  %983 = vmatmul.mubr.bf16.gmra.mrb[4].mxu1 %v1030_v15 }
  0x50   :  { %970 = vmatprep.mubr.bf16.mxu0 %v1031_v16  ;;  %986 = vmatprep.mubr.bf16.mxu1 %v1032_v17 }
  0x57   :  { %971 = vmatmul.mubr.bf16.gmra.mrb[8].mxu0 %v1033_v18  ;;  %987 = vmatmul.mubr.bf16.gmra.mrb[8].mxu1 %v1034_v19 }
  0x58   :  { %974 = vmatprep.mubr.bf16.mxu0 %v1035_v20  ;;  %990 = vmatprep.mubr.bf16.mxu1 %v1036_v21 }
  0x5f   :  { %975 = vmatmul.mubr.bf16.gmra.mrb[12].mxu0 %v1037_v22  ;;  %991 = vmatmul.mubr.bf16.gmra.mrb[12].mxu1 %v1038_v23 }
 0x11a   :  { %v964_v24 = vpop.f32.mrb[0].mxu0  ;;  %v980_v25 = vpop.f32.mrb[0].mxu1 }
 0x11b   :  { %v335_v26 = vpop.f32.mrb[1].mxu0  ;;  %v399_v27 = vpop.f32.mrb[1].mxu1 }
 0x11c   :  { %v965_v28 = vpop.f32.mrb[2].mxu0  ;;  %v981_v29 = vpop.f32.mrb[2].mxu1 }
 0x11d   :  { %v835_v30 = vpack.c.bf16 %v965_v28, %v964_v24  ;;  %v875_v31 = vpack.c.bf16 %v981_v29, %v980_v25  ;;  %v338_v32 = vpop.f32.mrb[3].mxu0  ;;  %v402_v33 = vpop.f32.mrb[3].mxu1 }
 0x11e   :  { %v830_v34 = vpack.c.bf16 %v338_v32, %v335_v26  ;;  %v870_v35 = vpack.c.bf16 %v402_v33, %v399_v27 }
 0x11f   :  { %907 = vst [vmem:[#allocation8 + $0x8] sm:$0xff] %v835_v30   ;;  %915 = vst [vmem:[#allocation8 + $0x48] sm:$0xff] %v875_v31  }
 0x120   :  { %831 = vst [vmem:[#allocation8] sm:$0xff] %v830_v34   ;;  %914 = vst [vmem:[#allocation8 + $0x40] sm:$0xff] %v870_v35  }
 0x122   :  { %v968_v36 = vpop.f32.mrb[4].mxu0  ;;  %v984_v37 = vpop.f32.mrb[4].mxu1 }
 0x123   :  { %v351_v38 = vpop.f32.mrb[5].mxu0  ;;  %v415_v39 = vpop.f32.mrb[5].mxu1 }
 0x124   :  { %v969_v40 = vpop.f32.mrb[6].mxu0  ;;  %v985_v41 = vpop.f32.mrb[6].mxu1 }
 0x125   :  { %v845_v42 = vpack.c.bf16 %v969_v40, %v968_v36  ;;  %v885_v43 = vpack.c.bf16 %v985_v41, %v984_v37  ;;  %v354_v44 = vpop.f32.mrb[7].mxu0  ;;  %v418_v45 = vpop.f32.mrb[7].mxu1 }
 0x126   :  { %v840_v46 = vpack.c.bf16 %v354_v44, %v351_v38  ;;  %v880_v47 = vpack.c.bf16 %v418_v45, %v415_v39 }
 0x127   :  { %909 = vst [vmem:[#allocation8 + $0x18] sm:$0xff] %v845_v42   ;;  %917 = vst [vmem:[#allocation8 + $0x58] sm:$0xff] %v885_v43  }
 0x128   :  { %908 = vst [vmem:[#allocation8 + $0x10] sm:$0xff] %v840_v46   ;;  %916 = vst [vmem:[#allocation8 + $0x50] sm:$0xff] %v880_v47  }
 0x12a   :  { %v972_v48 = vpop.f32.mrb[8].mxu0  ;;  %v988_v49 = vpop.f32.mrb[8].mxu1 }
 0x12b   :  { %v367_v50 = vpop.f32.mrb[9].mxu0  ;;  %v431_v51 = vpop.f32.mrb[9].mxu1 }
 0x12c   :  { %v973_v52 = vpop.f32.mrb[10].mxu0  ;;  %v989_v53 = vpop.f32.mrb[10].mxu1 }
 0x12d   :  { %v855_v54 = vpack.c.bf16 %v973_v52, %v972_v48  ;;  %v895_v55 = vpack.c.bf16 %v989_v53, %v988_v49  ;;  %v370_v56 = vpop.f32.mrb[11].mxu0  ;;  %v434_v57 = vpop.f32.mrb[11].mxu1 }
 0x12e   :  { %v850_v58 = vpack.c.bf16 %v370_v56, %v367_v50  ;;  %v890_v59 = vpack.c.bf16 %v434_v57, %v431_v51 }
 0x12f   :  { %911 = vst [vmem:[#allocation8 + $0x28] sm:$0xff] %v855_v54   ;;  %919 = vst [vmem:[#allocation8 + $0x68] sm:$0xff] %v895_v55  }
 0x130   :  { %910 = vst [vmem:[#allocation8 + $0x20] sm:$0xff] %v850_v58   ;;  %918 = vst [vmem:[#allocation8 + $0x60] sm:$0xff] %v890_v59  }
 0x132   :  { %v976_v60 = vpop.f32.mrb[12].mxu0  ;;  %v992_v61 = vpop.f32.mrb[12].mxu1 }
 0x133   :  { %v383_v62 = vpop.f32.mrb[13].mxu0  ;;  %v447_v63 = vpop.f32.mrb[13].mxu1 }
 0x134   :  { %v977_v0 = vpop.f32.mrb[14].mxu0  ;;  %v993_v1 = vpop.f32.mrb[14].mxu1 }
 0x135   :  { %v865_v2 = vpack.c.bf16 %v977_v0, %v976_v60  ;;  %v905_v3 = vpack.c.bf16 %v993_v1, %v992_v61  ;;  %v386_v4 = vpop.f32.mrb[15].mxu0  ;;  %v450_v5 = vpop.f32.mrb[15].mxu1 }
 0x136   :  { %v860_v6 = vpack.c.bf16 %v386_v4, %v383_v62  ;;  %v900_v7 = vpack.c.bf16 %v450_v5, %v447_v63 }
 0x137   :  { %913 = vst [vmem:[#allocation8 + $0x38] sm:$0xff] %v865_v2   ;;  %921 = vst [vmem:[#allocation8 + $0x78] sm:$0xff] %v905_v3  }
 0x138   :  { %912 = vst [vmem:[#allocation8 + $0x30] sm:$0xff] %v860_v6   ;;  %920 = vst [vmem:[#allocation8 + $0x70] sm:$0xff] %v900_v7  }
 0x139   :  { %1094 = shalt.err (!%p1091_p6)
}
 0x13a   :  { %s1095_s10 = scalar_lea.hbm %s1178_s2, 2048 }
 0x13b   :  { %p1096_p7 = scmp.ne.s32.totalorder %s1178_s2, %s1095_s10  ;;  %p1099_p8 = scmp.lt.u32.totalorder %s1095_s10, %s1178_s2 }
 0x13d   :  { %p1101_p9 = pnand %p1099_p8, %p1096_p7 }
 0x13f   :  { %1104 = shalt.err (!%p1101_p9)
}
 0x140   :  { %732 = dma.vmem_to_hbm [thread:$0]  %s727_s6, 2048, %s1178_s2, [#allocation5], %s1112_s19, %s1112_s19, %s1113_s20  }
 0x141   :  { %1109 = dma.done.wait [#allocation5], 2048  }
 0x142   :  { %1110 = vsyncadd [#allocation5], 4294965248 }
 0x143   :  { %736 = vsyncpa [#allocation4], 1 }
 0x144   :  { %737 = vsyncpa [#allocation7], 1 }
 0x145   :  { %738 = vsyncpa [#allocation5], 1 }

</bundles_post_ra>
